<compile_context>
chip_gen: v5e
topology: v5e:2x2
jax: 0.10.0
libtpu: 0.0.40
codegen_flags: <defaults>
</compile_context>

<pallas_src>
import jax
import jax.numpy as jnp
from jax.experimental import pallas as pl
from jax.experimental.pallas import tpu as pltpu


def _round_up(x, m):
    return ((x + m - 1) // m) * m


def _linear_bias_kernel(x_ref, w_ref, b_ref, o_ref):
    """One (tm, N) output stripe: bf16 x @ w on the MXU, f32 acc, +bias, cast."""
    o_ref[...] = (
        jnp.dot(x_ref[...], w_ref[...], preferred_element_type=jnp.float32)
        + b_ref[...]
    ).astype(o_ref.dtype)


def patch_embedding_pallas(patches, weight, bias, *, tm=512,
                           out_dtype=jnp.bfloat16):
    """patches: (M, K), weight: (K, N), bias: (N,) -> (M, N) in out_dtype.

    Weight and bias stay VMEM-resident (single full K/N tile, fine for ViT
    dims where K, N <= ~1k); the grid is 1-D over M so the patches are
    streamed through HBM exactly once.
    """
    M, K = patches.shape
    K2, N = weight.shape
    assert K == K2 and bias.shape == (N,)

    # bf16 operands into the MXU, f32 accumulation (intentional precision
    # policy; matches bf16 ViT training/inference).
    patches = patches.astype(jnp.bfloat16)
    weight = weight.astype(jnp.bfloat16)
    bias2d = bias.astype(jnp.float32).reshape(1, N)

    # M-only grid.  tm is a multiple of 8 (sublane) unless it covers all of M.
    # The last block may overhang M; those rows are row-independent garbage
    # and their out-of-bounds output rows are dropped by the masked writeback.
    # For real ViT batches (M >= 2*tm) the grid has >= 2 steps, so the
    # "parallel" M axis shards cleanly across v7x's two TensorCores.
    tm = max(8, min(tm, _round_up(M, 8)))
    grid_m = pl.cdiv(M, tm)

    out_bytes = jnp.dtype(out_dtype).itemsize
    # Resident weight/bias + double-buffered x and out tiles + headroom.
    # Explicit limit so big tiles also work under v5e's 16 MiB scoped-VMEM
    # default, capped under v7x's 64 MiB physical VMEM.
    vmem_needed = (K * N * 2 + N * 4
                   + 2 * tm * K * 2
                   + 2 * tm * N * out_bytes)
    vmem_limit = min(vmem_needed + (16 << 20), 64 << 20)

    cost = pl.CostEstimate(
        flops=2 * M * K * N,
        transcendentals=0,
        bytes_accessed=M * K * 2 + K * N * 2 + M * N * out_bytes + N * 4,
    )

    # TODO(synk): if xprof shows the streamed x-tile DMA still exposed, bump
    # its depth with pipeline_mode=pl.Buffered(3) instead of shrinking tm.
    return pl.pallas_call(
        _linear_bias_kernel,
        out_shape=jax.ShapeDtypeStruct((M, N), out_dtype),
        grid_spec=pltpu.PrefetchScalarGridSpec(
            num_scalar_prefetch=0,
            grid=(grid_m,),
            in_specs=[
                pl.BlockSpec((tm, K), lambda i: (i, 0)),   # streamed patches
                pl.BlockSpec((K, N), lambda i: (0, 0)),    # VMEM-resident weight
                pl.BlockSpec((1, N), lambda i: (0, 0)),    # VMEM-resident bias
            ],
            out_specs=pl.BlockSpec((tm, N), lambda i: (i, 0)),
        ),
        compiler_params=pltpu.CompilerParams(
            dimension_semantics=("parallel",),
            vmem_limit_bytes=vmem_limit,
        ),
        cost_estimate=cost,
    )(patches, weight, bias2d)


def vit_patch_embedding(img, weight, bias, patch_size, *,
                        out_dtype=jnp.bfloat16):
    """img: (B, C, H, W) NCHW.  Returns (B, num_patches, dim) in out_dtype."""
    B, C, H, W = img.shape
    p = patch_size
    assert H % p == 0 and W % p == 0, (
        "Image dimensions must be divisible by the patch size.")
    h, w = H // p, W // p
    # einops 'b c (h p1) (w p2) -> b (h w) (p1 p2 c)', done in bf16 so the
    # NCHW-strided transpose pass moves half the HBM bytes.
    x = img.astype(jnp.bfloat16).reshape(B, C, h, p, w, p)
    x = jnp.transpose(x, (0, 2, 4, 3, 5, 1))              # (B, h, w, p1, p2, C)
    patches = x.reshape(B * h * w, p * p * C)             # (M, patch_dim)
    out = patch_embedding_pallas(patches, weight, bias, out_dtype=out_dtype)
    return out.reshape(B, h * w, weight.shape[1])


if __name__ == "__main__":
    # Small config consistent with the module: channels=4, image 16x16,
    # patch 4x4 -> num_patches=16, patch_dim=4*4*4=64, dim=32, batch=2.
    B, C, H, W = 2, 4, 16, 16
    patch_size = 4
    dim = 32
    patch_dim = C * patch_size * patch_size

    key = jax.random.PRNGKey(0)
    k_img, k_w, k_b = jax.random.split(key, 3)
    img = jax.random.normal(k_img, (B, C, H, W), dtype=jnp.float32)
    # Deterministic "nn.Linear(patch_dim, dim)" params (synthetic init).
    weight = jax.random.normal(k_w, (patch_dim, dim), dtype=jnp.float32) * 0.02
    bias = jax.random.normal(k_b, (dim,), dtype=jnp.float32) * 0.02

    out = vit_patch_embedding(img, weight, bias, patch_size)
    out = jax.block_until_ready(out)

    # Pure-JAX reference: same rearrange + linear, operands rounded to bf16 to
    # match the kernel's MXU compute dtype; kernel output is bf16.
    x = img.reshape(B, C, H // patch_size, patch_size, W // patch_size,
                    patch_size)
    x = jnp.transpose(x, (0, 2, 4, 3, 5, 1)).reshape(B, -1, patch_dim)
    xb = x.astype(jnp.bfloat16).astype(jnp.float32)
    wb = weight.astype(jnp.bfloat16).astype(jnp.float32)
    ref = xb @ wb + bias

    assert out.shape == (B, (H // patch_size) * (W // patch_size), dim)
    assert out.dtype == jnp.bfloat16
    err = float(jnp.max(jnp.abs(out.astype(jnp.float32) - ref)))
    assert err < 2e-2, err

    print("KERNEL_OK")
</pallas_src>

<mosaic_0001>
module attributes {stable_mosaic.version = 11 : i64} {
  func.func @_linear_bias_kernel(%arg0: i32, %arg1: memref<32x64xbf16, #tpu.memory_space<vmem>>, %arg2: memref<64x32xbf16, #tpu.memory_space<vmem>>, %arg3: memref<1x32xf32, #tpu.memory_space<vmem>>, %arg4: memref<32x32xbf16, #tpu.memory_space<vmem>>) attributes {dimension_semantics = [#tpu.dimension_semantics<parallel>], iteration_bounds = array<i64: 1>, scalar_prefetch = 0 : i64, scratch_operands = 0 : i64, tpu.core_type = #tpu.core_type<tc>, window_params = [{transform_indices = @transform_0, window_bounds = array<i64: 32, 64>}, {pipeline_mode = #tpu.pipeline_mode<synchronous>, transform_indices = @transform_1, window_bounds = array<i64: 64, 32>}, {pipeline_mode = #tpu.pipeline_mode<synchronous>, transform_indices = @transform_2, window_bounds = array<i64: 1, 32>}, {transform_indices = @transform_3, window_bounds = array<i64: 32, 32>}]} {
    %c0 = arith.constant 0 : index
    %c0_0 = arith.constant 0 : index
    %0 = vector.load %arg1[%c0, %c0_0] : memref<32x64xbf16, #tpu.memory_space<vmem>>, vector<32x64xbf16>
    %c0_1 = arith.constant 0 : index
    %c0_2 = arith.constant 0 : index
    %1 = vector.load %arg2[%c0_1, %c0_2] : memref<64x32xbf16, #tpu.memory_space<vmem>>, vector<64x32xbf16>
    %cst = arith.constant dense<0.000000e+00> : vector<32x32xf32>
    %2 = tpu.matmul %0, %1, %cst {dimension_numbers = #tpu.dot_dimension_numbers<[1], [0], [0], [1], [0, 0, 1, 1], [], []>} : vector<32x64xbf16>, vector<64x32xbf16>, vector<32x32xf32> -> vector<32x32xf32>
    %c0_3 = arith.constant 0 : index
    %c0_4 = arith.constant 0 : index
    %3 = vector.load %arg3[%c0_3, %c0_4] : memref<1x32xf32, #tpu.memory_space<vmem>>, vector<1x32xf32>
    %4 = vector.broadcast %3 : vector<1x32xf32> to vector<32x32xf32>
    %5 = arith.addf %2, %4 : vector<32x32xf32>
    %6 = arith.truncf %5 : vector<32x32xf32> to vector<32x32xbf16>
    %c0_5 = arith.constant 0 : index
    %c0_6 = arith.constant 0 : index
    %7 = vector.load %arg4[%c0_5, %c0_6] : memref<32x32xbf16, #tpu.memory_space<vmem>>, vector<32x32xbf16>
    tpu.vector_store %arg4[%c0_5, %c0_6], %6 {strides = array<i32>} : memref<32x32xbf16, #tpu.memory_space<vmem>>, vector<32x32xbf16>,
    return
  }
  func.func @transform_0(%arg0: i32) -> (i32, i32) {
    %c0_i32 = arith.constant 0 : i32
    %c0_i32_0 = arith.constant 0 : i32
    return %arg0, %c0_i32 : i32, i32
  }
  func.func @transform_1(%arg0: i32) -> (i32, i32) {
    %c0_i32 = arith.constant 0 : i32
    %c0_i32_0 = arith.constant 0 : i32
    %c0_i32_1 = arith.constant 0 : i32
    return %c0_i32, %c0_i32_0 : i32, i32
  }
  func.func @transform_2(%arg0: i32) -> (i32, i32) {
    %c0_i32 = arith.constant 0 : i32
    %c0_i32_0 = arith.constant 0 : i32
    %c0_i32_1 = arith.constant 0 : i32
    return %c0_i32, %c0_i32_0 : i32, i32
  }
  func.func @transform_3(%arg0: i32) -> (i32, i32) {
    %c0_i32 = arith.constant 0 : i32
    %c0_i32_0 = arith.constant 0 : i32
    return %arg0, %c0_i32 : i32, i32
  }
}

</mosaic_0001>

<bundles_post_ra>
// kernel: tpu_custom_call.1
= control target key start
LH: loop header
LB: loop body
LE: loop exit
PB: predicated region body
PF: predicated region fallthrough
CT: control target
= control target key end

     0   :  { %s236_s0 = inlined_call_operand.vmem [shape: bf16[32,64], index: 0, kind: input, shape index: {}]   ;;  %s237_s1 = inlined_call_operand.vmem [shape: bf16[64,32], index: 1, kind: input, shape index: {}]   ;;  %s238_s2 = inlined_call_operand.vmem [shape: f32[1,32], index: 2, kind: input, shape index: {}]   ;;  %s239_s3 = inlined_call_operand.hbm [shape: bf16[32,32], index: 3, kind: output, shape index: {}]  }
   0x1   :  { %v150_v0 = vld [vmem:[%s237_s1 + $0x18] sm:$0xff]  ;;  %v149_v1 = vld [vmem:[%s237_s1 + $0x10] sm:$0xff] }
   0x2   :  { %77 = vmatpush.bf16.msra.mxu0 %v150_v0  ;;  %151 = vmatpush.bf16.msra.mxu1 %v150_v0 }
   0x3   :  { %8 = vsyncpa [#allocation3], 0  ;;  %v148_v2 = vld [vmem:[%s237_s1 + $0x8] sm:$0xff]  ;;  %v147_v3 = vld [vmem:[%s237_s1] sm:$0xff]  ;;  %vm66_vm0 = vcmask 523264   ;;  %vm96_vm1 = vcmask 257024  }
   0x4   :  { %v145_v4 = vld [vmem:[%s236_s0] sm:$0xff]  ;;  %v146_v5 = vld [vmem:[%s236_s0 + $0x8] sm:$0xff]  ;;  %s185_s0 = smov [#allocation2]   ;;  %s107_s28 = sshll.u32 %s239_s3, 4  ;;  %s108_s28 = int_to_ptr.hbm [resolvable:$true] %s107_s28 }
   0x5   :  { %v158_v6 = vld [vmem:[%s238_s2] ss:$0 sm:$0xff]  ;;  %s105_s1 = sshll.u32 %s185_s0, 4  ;;  %s186_s2 = smov 64   ;;  %s106_s1 = int_to_ptr.vmem [resolvable:$true] %s105_s1 }
   0x6   :  { %78 = vmatpush.bf16.msra.mxu0 %v149_v1  ;;  %152 = vmatpush.bf16.msra.mxu1 %v149_v1  ;;  %s187_s29 = smov 4  }
   0xa   :  { %79 = vmatpush.bf16.msra.mxu0 %v148_v2  ;;  %153 = vmatpush.bf16.msra.mxu1 %v148_v2 }
   0xe   :  { %80 = vmatpush.bf16.msra.mxu0 %v147_v3  ;;  %154 = vmatpush.bf16.msra.mxu1 %v147_v3 }
  0x11   :  { %143 = vmatmul.msk.bf16.vlgmr.msra.gmra.mxu0 %vm66_vm0, %v145_v4  ;;  %144 = vmatmul.msk.bf16.vlgmr.msra.gmra.mxu1 %vm66_vm0, %v146_v5 }
  0x8e   :  { %v82_v7 = vpop.f32.mrf.mxu0  ;;  %v87_v8 = vpop.f32.mrf.mxu1 }
  0x8f   :  { %v83_v9 = vadd.f32 %v158_v6, %v82_v7  ;;  %v88_v10 = vadd.f32 %v158_v6, %v87_v8 }
  0x91   :  { %v92_v11 = vpack.c.bf16 %v83_v9, %v83_v9  ;;  %v94_v12 = vpack.c.bf16 %v88_v10, %v88_v10 }
  0x93   :  { %97 = vst.msk [vmem:[#allocation2] sm:$0xf] %vm96_vm1, %v92_v11 }
  0x94   :  { %99 = vst.msk [vmem:[#allocation2 + $0x8] sm:$0xf] %vm96_vm1, %v94_v12 }
  0x96   :  { %v84_v13 = vpop.f32.mrf.mxu0  ;;  %v89_v14 = vpop.f32.mrf.mxu1 }
  0x97   :  { %v85_v15 = vadd.f32 %v158_v6, %v84_v13  ;;  %v90_v16 = vadd.f32 %v158_v6, %v89_v14 }
  0x99   :  { %v93_v17 = vpack.c.bf16 %v85_v15, %v85_v15  ;;  %v95_v18 = vpack.c.bf16 %v90_v16, %v90_v16 }
  0x9b   :  { %98 = vst.msk [vmem:[#allocation2 + $0x4] sm:$0xf] %vm96_vm1, %v93_v17 }
  0x9c   :  { %100 = vst.msk [vmem:[#allocation2 + $0xc] sm:$0xf] %vm96_vm1, %v95_v18 }
  0x9d   :  { %113 = dma.vmem_to_hbm [thread:$0]  %s106_s1, 256, %s108_s28, [#allocation3], %s186_s2, %s186_s2, %s187_s29  }
  0x9e   :  { %183 = dma.done.wait [#allocation3], 256  }
  0x9f   :  { %184 = vsyncadd [#allocation3], 4294967040 }
  0xa0   :  { %118 = vsyncpa [#allocation3], 1 }

</bundles_post_ra>
